<compile_context>
chip_gen: v7x
topology: tpu7x:2x2x1
jax: 0.10.0
libtpu: 0.0.40
codegen_flags: <defaults>
</compile_context>

<pallas_src>
import math
import jax
import jax.numpy as jnp
from jax.experimental import pallas as pl
from jax.experimental.pallas import tpu as pltpu

IN_F = 5
HID_F = 200
OUT_F = 4

# Padded (lane/sublane aligned) sizes used inside the kernel.
IN_PAD = 8      # contraction depth layer 1 (row 5 carries b1, rows 6-7 zero)
HID_PAD = 256   # multiple of 128 lanes (col 200 = constant-1 bias unit)
OUT_PAD = 8     # lane-minimal output padding; block last dim == array last dim


def _round_up(n, m):
    return ((n + m - 1) // m) * m


def mlp_kernel(x_ref, w1_ref, w2_ref, o_ref):
    # x_ref: (TB, 8) bf16, w1_ref: (8, 256) bf16, w2_ref: (256, 8) bf16
    # o_ref: (TB, 8) f32
    h = jnp.dot(x_ref[...], w1_ref[...], preferred_element_type=jnp.float32)
    h = jnp.maximum(h, 0.0)                      # ReLU in f32; h[:,200] == 1.0
    out = jnp.dot(h.astype(jnp.bfloat16), w2_ref[...],
                  preferred_element_type=jnp.float32)
    o_ref[...] = out.astype(o_ref.dtype)


def prepare_params(w1, b1, w2, b2):
    """Pad/cast weights ONCE (bias-folded, bf16). Call outside the hot loop.

    w1: (5, 200), b1: (1, 200), w2: (200, 4), b2: (1, 4) — weights stored
    (in, out), i.e. transposed relative to PyTorch's (out, in) layout.
    """
    w1_p = jnp.zeros((IN_PAD, HID_PAD), jnp.float32)
    w1_p = w1_p.at[:IN_F, :HID_F].set(w1)
    w1_p = w1_p.at[IN_F, :HID_F].set(b1.reshape(-1))   # fold b1 (x col 5 == 1)
    w1_p = w1_p.at[IN_F, HID_F].set(1.0)                # hidden col 200 -> 1.0
    w1_p = w1_p.astype(jnp.bfloat16)

    w2_p = jnp.zeros((HID_PAD, OUT_PAD), jnp.float32)
    w2_p = w2_p.at[:HID_F, :OUT_F].set(w2)
    w2_p = w2_p.at[HID_F, :OUT_F].set(b2.reshape(-1))   # fold b2 (h col 200==1)
    w2_p = w2_p.astype(jnp.bfloat16)
    return w1_p, w2_p


def net_forward(x, w1_p, w2_p, *, tb=4096):
    """x: (B, 5) float32 -> (B, 4) float32.  w1_p/w2_p from prepare_params."""
    B = x.shape[0]
    # Batch tile: multiple of 16 (bf16 sublane packing), at most the padded B.
    tb = max(16, _round_up(tb, 16))
    tb_eff = min(tb, _round_up(B, 16))
    b_pad = _round_up(B, tb_eff)
    grid = (b_pad // tb_eff,)

    # Per-call x prep: pad rows to b_pad, append the constant-1 bias column
    # (index 5) and zero columns 6-7, cast to bf16.
    x_rows = jnp.pad(x, ((0, b_pad - B), (0, 0)))
    x_p = jnp.concatenate(
        [x_rows,
         jnp.ones((b_pad, 1), x.dtype),
         jnp.zeros((b_pad, IN_PAD - IN_F - 1), x.dtype)],
        axis=1).astype(jnp.bfloat16)

    out_padded = pl.pallas_call(
        mlp_kernel,
        out_shape=jax.ShapeDtypeStruct((b_pad, OUT_PAD), jnp.float32),
        grid=grid,
        in_specs=[
            pl.BlockSpec((tb_eff, IN_PAD), lambda i: (i, 0)),     # streamed x
            pl.BlockSpec((IN_PAD, HID_PAD), lambda i: (0, 0)),    # resident W1
            pl.BlockSpec((HID_PAD, OUT_PAD), lambda i: (0, 0)),   # resident W2
        ],
        out_specs=pl.BlockSpec((tb_eff, OUT_PAD), lambda i: (i, 0)),
        compiler_params=pltpu.CompilerParams(
            dimension_semantics=("parallel",),   # batch axis -> both TCs (v7x)
        ),
    )(x_p, w1_p, w2_p)

    # Slice back to the logical (B, 4) output.
    return out_padded[:B, :OUT_F]


def init_params(key):
    """Deterministic init mirroring torch.nn.Linear defaults:
    uniform(-1/sqrt(fan_in), 1/sqrt(fan_in)) for both weight and bias."""
    k1, k2, k3, k4 = jax.random.split(key, 4)
    bound1 = 1.0 / math.sqrt(IN_F)
    bound2 = 1.0 / math.sqrt(HID_F)
    # Stored as (in, out) — transposed relative to PyTorch's (out, in).
    w1 = jax.random.uniform(k1, (IN_F, HID_F), jnp.float32, -bound1, bound1)
    b1 = jax.random.uniform(k2, (1, HID_F), jnp.float32, -bound1, bound1)
    w2 = jax.random.uniform(k3, (HID_F, OUT_F), jnp.float32, -bound2, bound2)
    b2 = jax.random.uniform(k4, (1, OUT_F), jnp.float32, -bound2, bound2)
    return w1, b1, w2, b2


if __name__ == "__main__":
    key = jax.random.PRNGKey(0)
    kx, kp = jax.random.split(key)

    batch = 24                      # small test shape; tb=16 -> 2 grid steps
    x = jax.random.normal(kx, (batch, IN_F), jnp.float32)
    w1, b1, w2, b2 = init_params(kp)
    w1_p, w2_p = prepare_params(w1, b1, w2, b2)   # one-time weight prep

    out = net_forward(x, w1_p, w2_p, tb=16)
    jax.block_until_ready(out)
    assert out.shape == (batch, OUT_F)

    # Reference mirroring the kernel's bf16 casts (biases folded -> bf16,
    # f32 accumulation) — should match up to summation order.
    f32 = jnp.float32
    xb = x.astype(jnp.bfloat16).astype(f32)
    w1b = w1.astype(jnp.bfloat16).astype(f32)
    b1b = b1.astype(jnp.bfloat16).astype(f32)
    w2b = w2.astype(jnp.bfloat16).astype(f32)
    b2b = b2.astype(jnp.bfloat16).astype(f32)
    h_ref = jnp.maximum(xb @ w1b + b1b, 0.0)
    ref_bf16 = h_ref.astype(jnp.bfloat16).astype(f32) @ w2b + b2b
    assert jnp.allclose(out, ref_bf16, atol=1e-3, rtol=1e-3)

    # Sanity check against the full f32 PyTorch-equivalent math (bf16
    # round-off tolerance; intentional precision tradeoff).
    ref_f32 = jnp.maximum(x @ w1 + b1, 0.0) @ w2 + b2
    assert jnp.allclose(out, ref_f32, atol=5e-2, rtol=5e-2)

    print("KERNEL_OK")
</pallas_src>

<mosaic_0001>
module attributes {stable_mosaic.version = 11 : i64} {
  func.func @mlp_kernel(%arg0: i32, %arg1: memref<16x8xbf16, #tpu.memory_space<vmem>>, %arg2: memref<8x256xbf16, #tpu.memory_space<vmem>>, %arg3: memref<256x8xbf16, #tpu.memory_space<vmem>>, %arg4: memref<16x8xf32, #tpu.memory_space<vmem>>) attributes {dimension_semantics = [#tpu.dimension_semantics<parallel>], iteration_bounds = array<i64: 2>, scalar_prefetch = 0 : i64, scratch_operands = 0 : i64, tpu.core_type = #tpu.core_type<tc>, window_params = [{transform_indices = @transform_0, window_bounds = array<i64: 16, 8>}, {pipeline_mode = #tpu.pipeline_mode<synchronous>, transform_indices = @transform_1, window_bounds = array<i64: 8, 256>}, {pipeline_mode = #tpu.pipeline_mode<synchronous>, transform_indices = @transform_2, window_bounds = array<i64: 256, 8>}, {transform_indices = @transform_3, window_bounds = array<i64: 16, 8>}]} {
    %c0 = arith.constant 0 : index
    %c0_0 = arith.constant 0 : index
    %0 = vector.load %arg1[%c0, %c0_0] : memref<16x8xbf16, #tpu.memory_space<vmem>>, vector<16x8xbf16>
    %c0_1 = arith.constant 0 : index
    %c0_2 = arith.constant 0 : index
    %1 = vector.load %arg2[%c0_1, %c0_2] : memref<8x256xbf16, #tpu.memory_space<vmem>>, vector<8x256xbf16>
    %cst = arith.constant dense<0.000000e+00> : vector<16x256xf32>
    %2 = tpu.matmul %0, %1, %cst {dimension_numbers = #tpu.dot_dimension_numbers<[1], [0], [0], [1], [0, 0, 1, 1], [], []>} : vector<16x8xbf16>, vector<8x256xbf16>, vector<16x256xf32> -> vector<16x256xf32>
    %cst_3 = arith.constant 0.000000e+00 : f32
    %3 = vector.broadcast %cst_3 : f32 to vector<16x256xf32>
    %4 = arith.maximumf %2, %3 : vector<16x256xf32>
    %5 = arith.truncf %4 : vector<16x256xf32> to vector<16x256xbf16>
    %c0_4 = arith.constant 0 : index
    %c0_5 = arith.constant 0 : index
    %6 = vector.load %arg3[%c0_4, %c0_5] : memref<256x8xbf16, #tpu.memory_space<vmem>>, vector<256x8xbf16>
    %cst_6 = arith.constant dense<0.000000e+00> : vector<16x8xf32>
    %7 = tpu.matmul %5, %6, %cst_6 {dimension_numbers = #tpu.dot_dimension_numbers<[1], [0], [0], [1], [0, 0, 1, 1], [], []>} : vector<16x256xbf16>, vector<256x8xbf16>, vector<16x8xf32> -> vector<16x8xf32>
    %c0_7 = arith.constant 0 : index
    %c0_8 = arith.constant 0 : index
    %8 = vector.load %arg4[%c0_7, %c0_8] : memref<16x8xf32, #tpu.memory_space<vmem>>, vector<16x8xf32>
    tpu.vector_store %arg4[%c0_7, %c0_8], %7 {strides = array<i32>} : memref<16x8xf32, #tpu.memory_space<vmem>>, vector<16x8xf32>,
    return
  }
  func.func @transform_0(%arg0: i32) -> (i32, i32) {
    %c0_i32 = arith.constant 0 : i32
    %c0_i32_0 = arith.constant 0 : i32
    return %arg0, %c0_i32 : i32, i32
  }
  func.func @transform_1(%arg0: i32) -> (i32, i32) {
    %c0_i32 = arith.constant 0 : i32
    %c0_i32_0 = arith.constant 0 : i32
    %c0_i32_1 = arith.constant 0 : i32
    return %c0_i32, %c0_i32_0 : i32, i32
  }
  func.func @transform_2(%arg0: i32) -> (i32, i32) {
    %c0_i32 = arith.constant 0 : i32
    %c0_i32_0 = arith.constant 0 : i32
    %c0_i32_1 = arith.constant 0 : i32
    return %c0_i32, %c0_i32_0 : i32, i32
  }
  func.func @transform_3(%arg0: i32) -> (i32, i32) {
    %c0_i32 = arith.constant 0 : i32
    %c0_i32_0 = arith.constant 0 : i32
    return %arg0, %c0_i32 : i32, i32
  }
}

</mosaic_0001>

<bundles_post_ra>
// kernel: tpu_custom_call.1
= control target key start
LH: loop header
LB: loop body
LE: loop exit
PB: predicated region body
PF: predicated region fallthrough
CT: control target
= control target key end

     0   :  { %s586_s12 = smov 0   ;;  %s661_s0 = inlined_call_operand.vmem [shape: bf16[32,8], index: 0, kind: input, shape index: {}]   ;;  %s662_s1 = inlined_call_operand.vmem [shape: bf16[8,256], index: 1, kind: input, shape index: {}]   ;;  %s663_s2 = inlined_call_operand.vmem [shape: bf16[256,8], index: 2, kind: input, shape index: {}]   ;;  %s664_s3 = inlined_call_operand.vmem [shape: f32[32,8], index: 3, kind: output, shape index: {}]  }
   0x1 LB: > { %s475_s13 = sadd.s32 4294967295, %s563_s12   ;;  %p479_p0 = scmp.ge.s32.totalorder %s563_s12, 1  ;;  %s563_s12 = sphi %s586_s12, %s13_s12  }
   0x2   : > { %p138_p1 = scmp.lt.s32.totalorder %s563_s12, 3 }
   0x4   : > { %p139_p2 = pnand %p479_p0, %p138_p1 }
   0x5   : > { %v177_v0 = vld [vmem:[%s662_s1] sm:$0xff] (!%p139_p2)  ;;  %vm192_vm0 = vcmask (!%p139_p2), 1043456   ;;  %s480_s16 = sshll.u32 (!%p139_p2), %s475_s13, 1  ;;  %v565_v4 = vmov (!%p139_p2), 0   ;;  %v543_v7 = vld [vmem:[%s663_s2 + $0x48] sm:$0xff] (!%p139_p2)   ;;  %v545_v9 = vld [vmem:[%s663_s2 + $0x50] sm:$0xff] (!%p139_p2)  }
   0x6   : > { %142 = sbr.rel (%p139_p2) target bundleno = 455 (0x1c7), region = 32  ;;  %v541_v1 = vld [vmem:[%s663_s2 + $0x40] sm:$0xff] (!%p139_p2)   ;;  %v486_v2 = vcombine.high (!%p139_p2), %v177_v0, %v177_v0  ;;  %v485_v3 = vcombine.low (!%p139_p2), %v177_v0, %v177_v0  ;;  %231 = vmatprep.mubr.bf16.mxu0 (!%p139_p2), %v565_v4  ;;  %p163_p3 = scmp.lt.s32.totalorder (!%p139_p2), %s480_s16, 3  ;;  %v544_v8 = vld [vmem:[%s663_s2 + $0x8] sm:$0xff] (!%p139_p2)   ;;  %vm188_vm1 = vcmask (!%p139_p2), 64512   ;;  %v546_v10 = vld [vmem:[%s663_s2 + $0x10] sm:$0xff] (!%p139_p2)  }
   0x7   : > { %v542_v5 = vld [vmem:[%s663_s2] sm:$0xff] (!%p139_p2)   ;;  %507 = vmatprep.subr.bf16.mxu1 (!%p139_p2), %v541_v1  ;;  %v547_v12 = vld [vmem:[%s663_s2 + $0x58] sm:$0xff] (!%p139_p2)   ;;  %v551_v16 = vld [vmem:[%s663_s2 + $0x68] sm:$0xff] (!%p139_p2)  }
   0x8   : > { %487 = vmatprep.subr.msk.bf16.mxu0 (!%p139_p2), %vm192_vm0, %v486_v2  ;;  %v194_v6 = vsel (!%p139_p2), %vm192_vm0, %v485_v3, 0  ;;  %508 = vmatpush3.bf16.msra.mxu1 (!%p139_p2), %v542_v5  ;;  %v548_v13 = vld [vmem:[%s663_s2 + $0x18] sm:$0xff] (!%p139_p2)   ;;  %v549_v14 = vld [vmem:[%s663_s2 + $0x60] sm:$0xff] (!%p139_p2)   ;;  %v552_v17 = vld [vmem:[%s663_s2 + $0x28] sm:$0xff] (!%p139_p2)  }
   0x9   : > { %200 = vmatpush1.bf16.msra.mxu0 (!%p139_p2), %v194_v6  ;;  %509 = vmatprep.subr.bf16.mxu1 (!%p139_p2), %v543_v7  ;;  %v550_v15 = vld [vmem:[%s663_s2 + $0x20] sm:$0xff] (!%p139_p2)   ;;  %v553_v18 = vld [vmem:[%s663_s2 + $0x70] sm:$0xff] (!%p139_p2)   ;;  %v555_v20 = vld [vmem:[%s663_s2 + $0x78] sm:$0xff] (!%p139_p2)  }
   0xa   : > { %v554_v19 = vld [vmem:[%s663_s2 + $0x30] sm:$0xff] (!%p139_p2)   ;;  %v556_v21 = vld [vmem:[%s663_s2 + $0x38] sm:$0xff] (!%p139_p2)  }
   0xc   : > { %510 = vmatpush3.bf16.msra.mxu1 (!%p139_p2), %v544_v8 }
   0xd   : > { %s666_s16 = smov (!%p163_p3, %s480_s16), 3  ;;  %511 = vmatprep.subr.bf16.mxu1 %v545_v9 }
   0xe   : > { %s481_s25 = sshll.u32 %s666_s16, 2  ;;  %s483_s28 = sshll.u32 %s666_s16, 3 }
   0xf   : > { %s166_s30 = scalar_lea.vmem %s661_s0, %s481_s25  ;;  %s172_s4 = scalar_lea.vmem %s664_s3, %s483_s28 }
  0x10   : > { %v540_v11 = vld [vmem:[%s166_s30] sm:$0xff]   ;;  %512 = vmatpush3.bf16.msra.mxu1 %v546_v10 }
  0x11   : > { %488 = vmatmul.mubr.msk.bf16.vlgmr.msra.gmra.mrb[0].mxu0 %vm188_vm1, %v540_v11  ;;  %513 = vmatprep.subr.bf16.mxu1 %v547_v12 }
  0x14   : > { %514 = vmatpush3.bf16.msra.mxu1 %v548_v13 }
  0x15   : > { %515 = vmatprep.subr.bf16.mxu1 %v549_v14 }
  0x18   : > { %516 = vmatpush3.bf16.msra.mxu1 %v550_v15 }
  0x19   : > { %517 = vmatprep.subr.bf16.mxu1 %v551_v16 }
  0x1c   : > { %518 = vmatpush3.bf16.msra.mxu1 %v552_v17 }
  0x1d   : > { %519 = vmatprep.subr.bf16.mxu1 %v553_v18 }
  0x20   : > { %520 = vmatpush3.bf16.msra.mxu1 %v554_v19 }
  0x21   : > { %521 = vmatprep.subr.bf16.mxu1 %v555_v20 }
  0x24   : > { %522 = vmatpush3.bf16.msra.mxu1 %v556_v21 }
  0xe4   : > { %v233_v22 = vpop.f32.mrb[0].mxu0 }
  0xe5   : > { %v235_v23 = vpop.f32.mrb[1].mxu0  ;;  %v242_v25 = vmax.f32 %v233_v22, 0.0 }
  0xe6   : > { %v237_v24 = vpop.f32.mrb[2].mxu0  ;;  %v243_v28 = vmax.f32 %v235_v23, 0.0 }
  0xe7   : > { %v244_v26 = vmax.f32 %v237_v24, 0.0  ;;  %v239_v27 = vpop.f32.mrb[3].mxu0 }
  0xe8   : > { %v245_v29 = vmax.f32 %v239_v27, 0.0 }
  0xe9   : > { %v246_v30 = vpack.c.bf16 %v244_v26, %v242_v25 }
  0xea   : > { %v247_v31 = vpack.c.bf16 %v245_v29, %v243_v28 }
  0xec   : > { %408 = vmatprep.mubr.bf16.mxu1 %v247_v31 }
  0xed   : > { %409 = vmatmul.mubr.bf16.vlgmr.msra.gmra.mrb[0].mxu1 %v246_v30 }
 0x1c0   : > { %v523_v32 = vpop.f32.mrb[0].mxu1 }
 0x1c1   : > { %v524_v33 = vpop.f32.mrb[1].mxu1 }
 0x1c2   : > { %v525_v34 = vadd.f32 %v524_v33, %v523_v32  ;;  %v526_v35 = vpop.f32.mrb[2].mxu1 }
 0x1c3   : > { %v527_v36 = vpop.f32.mrb[3].mxu1 }
 0x1c4   : > { %417 = vst.msk [vmem:[%s172_s4] sm:$0xff] %vm188_vm1, %v525_v34  ;;  %v528_v37 = vadd.f32 %v527_v36, %v526_v35 }
 0x1c6   : > { %418 = vst.msk [vmem:[%s172_s4 + $0x8] sm:$0xff] %vm188_vm1, %v528_v37 }
 0x1c7 PF: > { %s13_s12 = sadd.s32 1, %s563_s12  }
 0x1c8   : > { %p10_p4 = scmp.ge.s32.totalorder %s13_s12, 4  }
 0x1ca   :  { %12 = sbr.rel (!%p10_p4) target bundleno = 1 (0x1), region = 62 }

</bundles_post_ra>
